<compile_context>
chip_gen: v7x
topology: tpu7x:2x2x1
jax: 0.10.0
libtpu: 0.0.40
codegen_flags: <defaults>
</compile_context>

<pallas_src>
import functools

import jax
import jax.numpy as jnp
from jax import lax
from jax.experimental import pallas as pl
from jax.experimental.pallas import tpu as pltpu


def _round_up(x, m):
    return (x + m - 1) // m * m


# ----------------------------------------------------------------------------
# Kernel: fused HBM row-gather (DMA)  [+ bf16 MXU projection]  + scale
# ----------------------------------------------------------------------------
def _embed_kernel(ids_ref, tbl_hbm, *rest, token_block, vocab_size, scale,
                  has_proj):
    """One token block:

    ids_ref : (T_pad,) int32 in SMEM (scalar prefetch) -> DMA gather indices
    tbl_hbm : (V, E_total) f32 embedding table, left in HBM (pl.ANY)
    proj_ref: (H, E_total) bf16 block-diagonal projection, VMEM resident
              (only present if has_proj)
    out_ref : (token_block, H or E_total) output tile
    rows_ref: (token_block, E_total) f32 VMEM scratch (gather destination)
    sem     : DMA semaphore
    """
    if has_proj:
        proj_ref, out_ref, rows_ref, sem = rest
    else:
        out_ref, rows_ref, sem = rest

    base = pl.program_id(0) * token_block

    # ---- 1) DMA row gather: issue all row copies, then drain the semaphore.
    @pl.loop(0, token_block)
    def _(t):
        idx = jnp.clip(ids_ref[base + t], 0, vocab_size - 1)
        pltpu.make_async_copy(tbl_hbm.at[pl.ds(idx, 1), :],
                              rows_ref.at[pl.ds(t, 1), :],
                              sem).start()

    @pl.loop(0, token_block)
    def _(t):
        # All copies have identical shape, so an equal-shaped descriptor waits
        # for exactly one completed row copy (order of completion irrelevant).
        pltpu.make_async_copy(tbl_hbm.at[pl.ds(0, 1), :],
                              rows_ref.at[pl.ds(0, 1), :],
                              sem).wait()

    rows = rows_ref[...]

    # ---- 2) projection on the MXU (bf16 operands, f32 accumulation) + scale.
    if has_proj:
        ctx = lax.dot_general(rows.astype(jnp.bfloat16), proj_ref[...],
                              (((1,), (1,)), ((), ())),
                              preferred_element_type=jnp.float32)
    else:
        ctx = rows
    out_ref[...] = (ctx * scale).astype(out_ref.dtype)


# ----------------------------------------------------------------------------
# pallas_call wrapper
# ----------------------------------------------------------------------------
def _gather_project_call(ids_pad, table, proj, *, vocab_size, scale,
                         token_block, out_dtype):
    T_pad = ids_pad.shape[0]
    V, E_total = table.shape
    has_proj = proj is not None
    H = proj.shape[0] if has_proj else E_total
    grid = (T_pad // token_block,)

    kernel = functools.partial(_embed_kernel, token_block=token_block,
                               vocab_size=vocab_size, scale=scale,
                               has_proj=has_proj)

    in_specs = [pl.BlockSpec(memory_space=pl.ANY)]        # table stays in HBM
    args = [table]
    if has_proj:
        in_specs.append(pl.BlockSpec((H, E_total), lambda i, ids: (0, 0)))
        args.append(proj)

    flops = int(2 * T_pad * E_total * H) if has_proj else int(T_pad * E_total)
    bytes_accessed = int(4 * ids_pad.size + 4 * T_pad * E_total
                         + (2 * H * E_total if has_proj else 0)
                         + jnp.dtype(out_dtype).itemsize * T_pad * H)

    return pl.pallas_call(
        kernel,
        out_shape=jax.ShapeDtypeStruct((T_pad, H), out_dtype),
        grid_spec=pltpu.PrefetchScalarGridSpec(
            num_scalar_prefetch=1,
            grid=grid,
            in_specs=in_specs,
            out_specs=pl.BlockSpec((token_block, H), lambda i, ids: (i, 0)),
            scratch_shapes=[
                pltpu.VMEM((token_block, E_total), jnp.float32),
                pltpu.SemaphoreType.DMA(()),
            ],
        ),
        compiler_params=pltpu.CompilerParams(
            dimension_semantics=("parallel",)),
        cost_estimate=pl.CostEstimate(flops=flops, transcendentals=0,
                                      bytes_accessed=bytes_accessed),
    )(ids_pad, *args)


# ----------------------------------------------------------------------------
# AdaptiveEmbedding.forward
# ----------------------------------------------------------------------------
def adaptive_embedding_forward(params, token_ids, *, vocab_size, embedding_size,
                               hidden_size, cutoffs, div_val=1,
                               token_block=256, out_dtype=jnp.float32):
    """params:
         div_val == 1 : {"emb_0": (V, E), ["proj_0": (H, E)]}
         div_val  > 1 : {"emb_i": (V_i, E_i), "proj_i": (H, E_i)} per cluster
    """
    emb_scale = float(hidden_size) ** 0.5
    orig_shape = token_ids.shape
    ids = token_ids.reshape(-1).astype(jnp.int32)
    T = ids.shape[0]

    # Large MXU-friendly token tiles (multiple of 128); don't over-pad tiny T.
    tb = max(128, _round_up(int(token_block), 128))
    tb = min(tb, _round_up(max(T, 1), 128))
    T_pad = _round_up(T, tb)
    ids_pad = jnp.pad(ids, (0, T_pad - T))   # pad rows are sliced off below

    if div_val == 1:
        table = params["emb_0"].astype(jnp.float32)
        proj = None
        if hidden_size != embedding_size:
            proj = params["proj_0"].astype(jnp.bfloat16)
    else:
        # Fold every cluster into one table + one block-diagonal projection so
        # the kernel does a single gather + single matmul per token.
        cutoff_ends = [0] + list(cutoffs) + [vocab_size]
        n_clusters = len(cutoff_ends) - 1
        e_dims = [int(params[f"emb_{ci}"].shape[1]) for ci in range(n_clusters)]
        e_total = sum(e_dims)
        table = jnp.zeros((vocab_size, e_total), jnp.float32)
        proj_parts = []
        off = 0
        for ci in range(n_clusters):
            l, r = cutoff_ends[ci], cutoff_ends[ci + 1]
            e_i = e_dims[ci]
            table = table.at[l:r, off:off + e_i].set(
                params[f"emb_{ci}"].astype(jnp.float32))
            proj_parts.append(params[f"proj_{ci}"].astype(jnp.bfloat16))
            off += e_i
        proj = jnp.concatenate(proj_parts, axis=1)     # (H, e_total)

    out = _gather_project_call(ids_pad, table, proj, vocab_size=vocab_size,
                               scale=emb_scale, token_block=tb,
                               out_dtype=out_dtype)
    out = out[:T]
    return out.reshape(orig_shape + (out.shape[-1],))


# ----------------------------------------------------------------------------
# Pure-JAX reference (mirrors the PyTorch module, for correctness only)
# ----------------------------------------------------------------------------
def reference_forward(params, token_ids, *, vocab_size, embedding_size,
                      hidden_size, cutoffs, div_val=1):
    emb_scale = float(hidden_size) ** 0.5
    if div_val == 1:
        embed = params["emb_0"][token_ids]
        if hidden_size != embedding_size:
            embed = embed @ params["proj_0"].T
    else:
        cutoff_ends = [0] + list(cutoffs) + [vocab_size]
        flat = token_ids.reshape(-1)
        acc = jnp.zeros((flat.shape[0], hidden_size), jnp.float32)
        for ci in range(len(cutoff_ends) - 1):
            l, r = cutoff_ends[ci], cutoff_ends[ci + 1]
            mask = ((flat >= l) & (flat < r)).astype(jnp.float32)[:, None]
            local = jnp.clip(flat - l, 0, r - l - 1)
            emb_i = params[f"emb_{ci}"][local] @ params[f"proj_{ci}"].T
            acc = acc + emb_i * mask
        embed = acc.reshape(token_ids.shape + (hidden_size,))
    return embed * emb_scale


# ----------------------------------------------------------------------------
if __name__ == "__main__":
    key = jax.random.PRNGKey(0)
    B, S = 2, 8
    init = lambda k, shape: 0.02 * jax.random.normal(k, shape, jnp.float32)

    # ---- Case 1: div_val == 1, hidden_size != embedding_size (projection) ----
    V1, E1, H1 = 64, 16, 32
    k0, k1, k2, key = jax.random.split(key, 4)
    params1 = {"emb_0": init(k0, (V1, E1)), "proj_0": init(k1, (H1, E1))}
    ids1 = jax.random.randint(k2, (B, S), 0, V1)
    out1 = adaptive_embedding_forward(params1, ids1, vocab_size=V1,
                                      embedding_size=E1, hidden_size=H1,
                                      cutoffs=[], div_val=1)
    out1 = jax.block_until_ready(out1)
    ref1 = reference_forward(params1, ids1, vocab_size=V1, embedding_size=E1,
                             hidden_size=H1, cutoffs=[], div_val=1)
    assert out1.shape == (B, S, H1)
    assert jnp.allclose(out1, ref1, atol=2e-3, rtol=2e-2), "case1 mismatch"

    # ---- Case 2: div_val == 1, hidden_size == embedding_size (no projection) --
    V2, E2 = 64, 32
    k0, k1, key = jax.random.split(key, 3)
    params2 = {"emb_0": init(k0, (V2, E2))}
    ids2 = jax.random.randint(k1, (B, S), 0, V2)
    out2 = adaptive_embedding_forward(params2, ids2, vocab_size=V2,
                                      embedding_size=E2, hidden_size=E2,
                                      cutoffs=[], div_val=1)
    out2 = jax.block_until_ready(out2)
    ref2 = reference_forward(params2, ids2, vocab_size=V2, embedding_size=E2,
                             hidden_size=E2, cutoffs=[], div_val=1)
    assert out2.shape == (B, S, E2)
    assert jnp.allclose(out2, ref2, atol=1e-5, rtol=1e-5), "case2 mismatch"

    # ---- Case 3: div_val == 2, cutoffs -> adaptive clusters -------------------
    V3, E3, H3 = 64, 32, 32
    cutoffs3 = [32]                  # clusters: [0,32) d_emb=32, [32,64) d_emb=16
    cutoff_ends = [0] + cutoffs3 + [V3]
    params3 = {}
    for ci in range(len(cutoff_ends) - 1):
        l, r = cutoff_ends[ci], cutoff_ends[ci + 1]
        d_emb = E3 // (2 ** ci)
        k0, k1, key = jax.random.split(key, 3)
        params3[f"emb_{ci}"] = init(k0, (r - l, d_emb))
        params3[f"proj_{ci}"] = init(k1, (H3, d_emb))
    k0, key = jax.random.split(key, 2)
    ids3 = jax.random.randint(k0, (B, S), 0, V3)
    out3 = adaptive_embedding_forward(params3, ids3, vocab_size=V3,
                                      embedding_size=E3, hidden_size=H3,
                                      cutoffs=cutoffs3, div_val=2)
    out3 = jax.block_until_ready(out3)
    ref3 = reference_forward(params3, ids3, vocab_size=V3, embedding_size=E3,
                             hidden_size=H3, cutoffs=cutoffs3, div_val=2)
    assert out3.shape == (B, S, H3)
    assert jnp.allclose(out3, ref3, atol=2e-3, rtol=2e-2), "case3 mismatch"

    print("KERNEL_OK")
</pallas_src>

<mosaic_0001>
module attributes {stable_mosaic.version = 11 : i64} {
  func.func @_embed_kernel(%arg0: i32, %arg1: memref<128xi32, #tpu.memory_space<smem>>, %arg2: memref<64x16xf32, #tpu.memory_space<any>>, %arg3: memref<32x16xbf16, #tpu.memory_space<vmem>>, %arg4: memref<128x32xf32, #tpu.memory_space<vmem>>, %arg5: memref<128x16xf32, #tpu.memory_space<vmem>>, %arg6: memref<!tpu.dma_semaphore, #tpu.memory_space<semaphore_mem>>) attributes {dimension_semantics = [#tpu.dimension_semantics<parallel>], iteration_bounds = array<i64: 1>, scalar_prefetch = 1 : i64, scratch_operands = 2 : i64, tpu.core_type = #tpu.core_type<tc>, window_params = [{}, {pipeline_mode = #tpu.pipeline_mode<synchronous>, transform_indices = @transform_1, window_bounds = array<i64: 32, 16>}, {transform_indices = @transform_2, window_bounds = array<i64: 128, 32>}]} {
    %c128_i32 = arith.constant 128 : i32
    %0 = arith.muli %arg0, %c128_i32 : i32
    %c0_i32 = arith.constant 0 : i32
    %c128_i32_0 = arith.constant 128 : i32
    %1 = arith.addi %c0_i32, %c128_i32_0 : i32
    %c1_i32 = arith.constant 1 : i32
    scf.for %arg7 = %c0_i32 to %1 step %c1_i32  : i32 {
      %c1_i32_11 = arith.constant 1 : i32
      %10 = arith.muli %arg7, %c1_i32_11 : i32
      %c0_i32_12 = arith.constant 0 : i32
      %11 = arith.addi %c0_i32_12, %10 : i32
      %12 = arith.addi %0, %11 : i32
      %13 = arith.index_cast %12 : i32 to index
      %14 = memref.load %arg1[%13] : memref<128xi32, #tpu.memory_space<smem>>
      %c0_i32_13 = arith.constant 0 : i32
      %c63_i32 = arith.constant 63 : i32
      %15 = arith.maxsi %c0_i32_13, %14 : i32
      %16 = arith.minsi %c63_i32, %15 : i32
      %c0_i32_14 = arith.constant 0 : i32
      %17 = tpu.memref_slice %arg2[%16, %c0_i32_14] : memref<64x16xf32, #tpu.memory_space<any>> -> memref<1x16xf32, #tpu.memory_space<any>>
      %c0_i32_15 = arith.constant 0 : i32
      %18 = tpu.memref_slice %arg5[%11, %c0_i32_15] : memref<128x16xf32, #tpu.memory_space<vmem>> -> memref<1x16xf32, #tpu.memory_space<vmem>>
      tpu.enqueue_dma source(%17 : memref<1x16xf32, #tpu.memory_space<any>>) target(%18 : memref<1x16xf32, #tpu.memory_space<vmem>>) target_semaphore(%arg6 : memref<!tpu.dma_semaphore, #tpu.memory_space<semaphore_mem>>)
    }
    %c128_i32_1 = arith.constant 128 : i32
    %c0_i32_2 = arith.constant 0 : i32
    %c128_i32_3 = arith.constant 128 : i32
    %2 = arith.addi %c0_i32_2, %c128_i32_3 : i32
    %c1_i32_4 = arith.constant 1 : i32
    scf.for %arg7 = %c0_i32_2 to %2 step %c1_i32_4  : i32 {
      %c0_i32_11 = arith.constant 0 : i32
      %c0_i32_12 = arith.constant 0 : i32
      %10 = tpu.memref_slice %arg2[%c0_i32_11, %c0_i32_12] : memref<64x16xf32, #tpu.memory_space<any>> -> memref<1x16xf32, #tpu.memory_space<any>>
      %c0_i32_13 = arith.constant 0 : i32
      %c0_i32_14 = arith.constant 0 : i32
      %11 = tpu.memref_slice %arg5[%c0_i32_13, %c0_i32_14] : memref<128x16xf32, #tpu.memory_space<vmem>> -> memref<1x16xf32, #tpu.memory_space<vmem>>
      tpu.wait_dma2 semaphore(%arg6 : memref<!tpu.dma_semaphore, #tpu.memory_space<semaphore_mem>>) src(%10 : memref<1x16xf32, #tpu.memory_space<any>>) dst(%11 : memref<1x16xf32, #tpu.memory_space<vmem>>)
    }
    %c0 = arith.constant 0 : index
    %c0_5 = arith.constant 0 : index
    %3 = vector.load %arg5[%c0, %c0_5] : memref<128x16xf32, #tpu.memory_space<vmem>>, vector<128x16xf32>
    %4 = arith.truncf %3 : vector<128x16xf32> to vector<128x16xbf16>
    %c0_6 = arith.constant 0 : index
    %c0_7 = arith.constant 0 : index
    %5 = vector.load %arg3[%c0_6, %c0_7] : memref<32x16xbf16, #tpu.memory_space<vmem>>, vector<32x16xbf16>
    %cst = arith.constant dense<0.000000e+00> : vector<128x32xf32>
    %6 = tpu.matmul %4, %5, %cst {dimension_numbers = #tpu.dot_dimension_numbers<[1], [1], [0], [0], [0, 0, 1, 0], [], []>} : vector<128x16xbf16>, vector<32x16xbf16>, vector<128x32xf32> -> vector<128x32xf32>
    %cst_8 = arith.constant 5.65685415 : f32
    %7 = vector.broadcast %cst_8 : f32 to vector<128x32xf32>
    %8 = arith.mulf %6, %7 : vector<128x32xf32>
    %c0_9 = arith.constant 0 : index
    %c0_10 = arith.constant 0 : index
    %9 = vector.load %arg4[%c0_9, %c0_10] : memref<128x32xf32, #tpu.memory_space<vmem>>, vector<128x32xf32>
    tpu.vector_store %arg4[%c0_9, %c0_10], %8 {strides = array<i32>} : memref<128x32xf32, #tpu.memory_space<vmem>>, vector<128x32xf32>,
    return
  }
  func.func @transform_1(%arg0: i32, %arg1: memref<128xi32, #tpu.memory_space<smem>>) -> (i32, i32) {
    %c0_i32 = arith.constant 0 : i32
    %c0_i32_0 = arith.constant 0 : i32
    %c0_i32_1 = arith.constant 0 : i32
    return %c0_i32, %c0_i32_0 : i32, i32
  }
  func.func @transform_2(%arg0: i32, %arg1: memref<128xi32, #tpu.memory_space<smem>>) -> (i32, i32) {
    %c0_i32 = arith.constant 0 : i32
    %c0_i32_0 = arith.constant 0 : i32
    return %arg0, %c0_i32 : i32, i32
  }
}

</mosaic_0001>

<bundles_post_ra>
// kernel: tpu_custom_call.1
= control target key start
LH: loop header
LB: loop body
LE: loop exit
PB: predicated region body
PF: predicated region fallthrough
CT: control target
= control target key end

     0   :  { %s534_s0 = inlined_call_operand.vmem [shape: s32[128], index: 0, kind: input, shape index: {}]   ;;  %s535_s1 = inlined_call_operand.vmem [shape: f32[64,16], index: 1, kind: input, shape index: {}]   ;;  %s536_s2 = inlined_call_operand.vmem [shape: bf16[32,16], index: 2, kind: input, shape index: {}]   ;;  %s537_s3 = inlined_call_operand.vmem [shape: f32[128,32], index: 3, kind: output, shape index: {}]  }
   0x1   :  { %s8_s14 = sshll.u32 %s534_s0, 4  ;;  %s9_s14 = int_to_ptr.vmem [resolvable:$true] %s8_s14 }
   0x2   :  { %s391_s15 = scalar_lea.vmem %s9_s14, 16  ;;  %p396_p1 = scmp.lt.s32.totalorder %s9_s14, %s9_s14 }
   0x3   :  { %p392_p0 = scmp.ne.s32.totalorder %s9_s14, %s391_s15  ;;  %p397_p2 = scmp.lt.s32.totalorder %s391_s15, %s391_s15 }
   0x5   :  { %p398_p3 = por %p397_p2, %p396_p1 }
   0x7   :  { %p399_p4 = pnand %p398_p3, %p392_p0 }
   0x9   :  { %402 = shalt.err (!%p399_p4)  }
   0xa   :  { %s423_s16 = smov [#allocation5]  }
   0xb   :  { %11 = dma.vmem_to_smem %s9_s14, 16, %s423_s16, [#allocation4] }
   0xc   :  { %411 = dma.done.wait [#allocation4], 16 }
   0xd   :  { %412 = vsyncadd [#allocation4], 4294967280 }
   0xe   :  { %13 = sfence }
   0xf   :  { %s415_s17 = smov 0  }
  0x10 LB: > { %s25_s18 = sld [smem:[#allocation5 + %s417_s17]]  ;;  %s31_s21 = scalar_lea.vmem [#allocation2], %s417_s17  ;;  %s417_s17 = sphi %s415_s17, %s23_s17  }
  0x16   : > { %p26_p5 = scmp.gt.s32.totalorder %s25_s18, 0  ;;  %p316_p6 = scmp.lt.s32.totalorder %s25_s18, 63 }
  0x18   : > { %s539_s18 = smov (!%p26_p5, %s25_s18), 0 }
  0x19   : > { %s541_s18 = smov (!%p316_p6, %s539_s18), 63 }
  0x1a   : > { %s30_s20 = scalar_lea.vmem %s535_s1, %s541_s18 }
  0x1b   : > { %v49_v0 = vld [vmem:[%s30_s20] sm:$0x1] }
  0x1c   : > { %50 = vst [vmem:[%s31_s21] sm:$0x1] %v49_v0 }
  0x1d   : > { %75 = vsyncadd [#allocation3], 16  ;;  %s23_s17 = sadd.s32 1, %s417_s17  }
  0x1e   : > { %p20_p7 = scmp.ge.s32.totalorder %s23_s17, 128  }
  0x1f   :  { %s419_s22 = smov (%p20_p7), 0  }
  0x20   :  { %22 = sbr.rel (!%p20_p7) target bundleno = 16 (0x10), region = 80 }
  0x27 LB: > { %413 = dma.done.wait [#allocation3], 16  ;;  %s421_s22 = sphi %s419_s22, %s81_s22  }
  0x28   : > { %414 = vsyncadd [#allocation3], 4294967280  ;;  %s81_s22 = sadd.s32 1, %s421_s22  }
  0x29   : > { %p78_p8 = scmp.ge.s32.totalorder %s81_s22, 128  }
  0x2a   :  { %v389_v1 = vld [vmem:[%s536_s2] sm:$0xff] (%p78_p8)   ;;  %vm123_vm0 = vcmask (%p78_p8), 130048   ;;  %v390_v2 = vld [vmem:[%s536_s2 + $0x8] sm:$0xff] (%p78_p8)   ;;  %v87_v11 = vld [vmem:[#allocation2 + $0x10] sm:$0xff] (%p78_p8)  ;;  %vm267_vm1 = vcmask (%p78_p8), 261120  }
  0x2b   :  { %80 = sbr.rel (!%p78_p8) target bundleno = 39 (0x27), region = 91  ;;  %368 = vmatprep.subr.msk.bf16.mxu0 (%p78_p8), %vm123_vm0, %v389_v1  ;;  %369 = vmatprep.subr.msk.bf16.mxu1 (%p78_p8), %vm123_vm0, %v389_v1  ;;  %v149_v3 = vsel (%p78_p8), %vm123_vm0, %v389_v1, 0  ;;  %v85_v4 = vld [vmem:[#allocation2] sm:$0xff] (%p78_p8)  ;;  %v86_v5 = vld [vmem:[#allocation2 + $0x8] sm:$0xff] (%p78_p8)  ;;  %v152_v10 = vsel (%p78_p8), %vm123_vm0, %v390_v2, 0  ;;  %v88_v12 = vld [vmem:[#allocation2 + $0x18] sm:$0xff] (%p78_p8) }
  0x2c   :  { %v93_v6 = vld [vmem:[#allocation2 + $0x40] sm:$0xff] (%p78_p8)  ;;  %345 = vmatpush3.bf16.xpose.msra.mxu0 (%p78_p8), %v149_v3  ;;  %366 = vmatpush3.bf16.xpose.msra.mxu1 (%p78_p8), %v149_v3  ;;  %v101_v7 = vpack.c.bf16 (%p78_p8), %v86_v5, %v85_v4  ;;  %v94_v8 = vld [vmem:[#allocation2 + $0x48] sm:$0xff] (%p78_p8)  ;;  %v95_v13 = vld [vmem:[#allocation2 + $0x50] sm:$0xff] (%p78_p8)  ;;  %v102_v19 = vpack.c.bf16 (%p78_p8), %v88_v12, %v87_v11 }
  0x2d   :  { %370 = vmatprep.subr.msk.bf16.mxu0 (%p78_p8), %vm123_vm0, %v390_v2  ;;  %371 = vmatprep.subr.msk.bf16.mxu1 (%p78_p8), %vm123_vm0, %v390_v2  ;;  %v105_v9 = vpack.c.bf16 (%p78_p8), %v94_v8, %v93_v6  ;;  %v96_v14 = vld [vmem:[#allocation2 + $0x58] sm:$0xff] (%p78_p8)  ;;  %v89_v15 = vld [vmem:[#allocation2 + $0x20] sm:$0xff] (%p78_p8)  ;;  %v90_v16 = vld [vmem:[#allocation2 + $0x28] sm:$0xff] (%p78_p8) }
  0x2e   :  { %348 = vmatprep.mubr.msk.bf16.mxu0 (%p78_p8), %vm123_vm0, %v101_v7  ;;  %v97_v17 = vld [vmem:[#allocation2 + $0x60] sm:$0xff] (%p78_p8)  ;;  %v98_v18 = vld [vmem:[#allocation2 + $0x68] sm:$0xff] (%p78_p8)  ;;  %v106_v20 = vpack.c.bf16 (%p78_p8), %v96_v14, %v95_v13  ;;  %v103_v21 = vpack.c.bf16 (%p78_p8), %v90_v16, %v89_v15  ;;  %v91_v23 = vld [vmem:[#allocation2 + $0x30] sm:$0xff] (%p78_p8) }
  0x2f   :  { %356 = vmatprep.mubr.msk.bf16.mxu1 (%p78_p8), %vm123_vm0, %v105_v9  ;;  %v107_v22 = vpack.c.bf16 (%p78_p8), %v98_v18, %v97_v17  ;;  %v92_v24 = vld [vmem:[#allocation2 + $0x38] sm:$0xff] (%p78_p8)  ;;  %v99_v25 = vld [vmem:[#allocation2 + $0x70] sm:$0xff] (%p78_p8) }
  0x30   :  { %v100_v26 = vld [vmem:[#allocation2 + $0x78] sm:$0xff] (%p78_p8)  ;;  %v104_v27 = vpack.c.bf16 (%p78_p8), %v92_v24, %v91_v23 }
  0x31   :  { %v108_v28 = vpack.c.bf16 (%p78_p8), %v100_v26, %v99_v25 }
  0x34   :  { %347 = vmatpush3.bf16.xpose.msra.mxu0 %v152_v10  ;;  %367 = vmatpush3.bf16.xpose.msra.mxu1 %v152_v10 }
  0x3b   :  { %349 = vmatmul.mubr.msk.bf16.vlgmr.msra.gmra.mrb[0].mxu0 %vm123_vm0, %v102_v19  ;;  %357 = vmatmul.mubr.msk.bf16.vlgmr.msra.gmra.mrb[0].mxu1 %vm123_vm0, %v106_v20 }
  0x3c   :  { %352 = vmatprep.mubr.msk.bf16.mxu0 %vm123_vm0, %v103_v21  ;;  %360 = vmatprep.mubr.msk.bf16.mxu1 %vm123_vm0, %v107_v22 }
  0x43   :  { %353 = vmatmul.mubr.msk.bf16.gmra.mrb[4].mxu0 %vm123_vm0, %v104_v27  ;;  %361 = vmatmul.mubr.msk.bf16.gmra.mrb[4].mxu1 %vm123_vm0, %v108_v28 }
 0x10e   :  { %v350_v29 = vpop.f32.mrb[0].mxu0  ;;  %v358_v30 = vpop.f32.mrb[0].mxu1 }
 0x10f   :  { %v253_v31 = vmul.f32 5.656854, %v350_v29  ;;  %v261_v32 = vmul.f32 5.656854, %v358_v30  ;;  %v188_v33 = vpop.f32.mrb[1].mxu0  ;;  %v220_v34 = vpop.f32.mrb[1].mxu1 }
 0x110   :  { %v251_v35 = vmul.f32 5.656854, %v188_v33  ;;  %v259_v36 = vmul.f32 5.656854, %v220_v34  ;;  %v351_v37 = vpop.f32.mrb[2].mxu0  ;;  %v359_v38 = vpop.f32.mrb[2].mxu1 }
 0x111   :  { %270 = vst.msk [vmem:[%s537_s3 + $0x10] sm:$0xff] %vm267_vm1, %v253_v31  ;;  %278 = vst.msk [vmem:[%s537_s3 + $0x50] sm:$0xff] %vm267_vm1, %v261_v32  ;;  %v254_v39 = vmul.f32 5.656854, %v351_v37  ;;  %v262_v40 = vmul.f32 5.656854, %v359_v38 }
 0x112   :  { %v191_v41 = vpop.f32.mrb[3].mxu0  ;;  %v223_v42 = vpop.f32.mrb[3].mxu1  ;;  %268 = vst.msk [vmem:[%s537_s3] sm:$0xff] %vm267_vm1, %v251_v35  ;;  %276 = vst.msk [vmem:[%s537_s3 + $0x40] sm:$0xff] %vm267_vm1, %v259_v36 }
 0x113   :  { %v252_v43 = vmul.f32 5.656854, %v191_v41  ;;  %v260_v44 = vmul.f32 5.656854, %v223_v42  ;;  %271 = vst.msk [vmem:[%s537_s3 + $0x18] sm:$0xff] %vm267_vm1, %v254_v39  ;;  %279 = vst.msk [vmem:[%s537_s3 + $0x58] sm:$0xff] %vm267_vm1, %v262_v40 }
 0x115   :  { %269 = vst.msk [vmem:[%s537_s3 + $0x8] sm:$0xff] %vm267_vm1, %v252_v43  ;;  %277 = vst.msk [vmem:[%s537_s3 + $0x48] sm:$0xff] %vm267_vm1, %v260_v44 }
 0x116   :  { %v354_v45 = vpop.f32.mrb[4].mxu0  ;;  %v362_v46 = vpop.f32.mrb[4].mxu1 }
 0x117   :  { %v257_v47 = vmul.f32 5.656854, %v354_v45  ;;  %v265_v48 = vmul.f32 5.656854, %v362_v46  ;;  %v204_v49 = vpop.f32.mrb[5].mxu0  ;;  %v236_v50 = vpop.f32.mrb[5].mxu1 }
 0x118   :  { %v255_v51 = vmul.f32 5.656854, %v204_v49  ;;  %v263_v52 = vmul.f32 5.656854, %v236_v50  ;;  %v355_v53 = vpop.f32.mrb[6].mxu0  ;;  %v363_v54 = vpop.f32.mrb[6].mxu1 }
 0x119   :  { %274 = vst.msk [vmem:[%s537_s3 + $0x30] sm:$0xff] %vm267_vm1, %v257_v47  ;;  %282 = vst.msk [vmem:[%s537_s3 + $0x70] sm:$0xff] %vm267_vm1, %v265_v48  ;;  %v258_v55 = vmul.f32 5.656854, %v355_v53  ;;  %v266_v56 = vmul.f32 5.656854, %v363_v54 }
 0x11a   :  { %v207_v57 = vpop.f32.mrb[7].mxu0  ;;  %v239_v58 = vpop.f32.mrb[7].mxu1  ;;  %272 = vst.msk [vmem:[%s537_s3 + $0x20] sm:$0xff] %vm267_vm1, %v255_v51  ;;  %280 = vst.msk [vmem:[%s537_s3 + $0x60] sm:$0xff] %vm267_vm1, %v263_v52 }
 0x11b   :  { %v256_v59 = vmul.f32 5.656854, %v207_v57  ;;  %v264_v60 = vmul.f32 5.656854, %v239_v58  ;;  %275 = vst.msk [vmem:[%s537_s3 + $0x38] sm:$0xff] %vm267_vm1, %v258_v55  ;;  %283 = vst.msk [vmem:[%s537_s3 + $0x78] sm:$0xff] %vm267_vm1, %v266_v56 }
 0x11d   :  { %273 = vst.msk [vmem:[%s537_s3 + $0x28] sm:$0xff] %vm267_vm1, %v256_v59  ;;  %281 = vst.msk [vmem:[%s537_s3 + $0x68] sm:$0xff] %vm267_vm1, %v264_v60 }
 0x11e   :  { %288 = vsyncmov [#allocation3] }
 0x121   :  { %s289_s27 = vpop.sfrf %288 }
 0x122   :  { %p331_p9 = scmp.ne.s32.totalorder %s289_s27, 0 }
 0x124   :  { %293 = shalt.err (%p331_p9)  }

</bundles_post_ra>
